<compile_context>
chip_gen: v7x
topology: tpu7x:2x2x1
jax: 0.10.0
libtpu: 0.0.40
codegen_flags: <defaults>
</compile_context>

<pallas_src>
import jax
import jax.numpy as jnp
from jax.experimental import pallas as pl
from jax.experimental.pallas import tpu as pltpu

LANE = 128  # TPU lane width; fc3 output padded to a multiple of this for unmasked stores.


# --------------------------------------------------------------------------------------
# Kernel
# --------------------------------------------------------------------------------------
def class_head_kernel(x_ref, w1_ref, b1_ref, w2_ref, b2_ref, w3_ref, b3_ref, o_ref):
    # Cast the f32 input tile to bf16 in-VMEM (no extra HBM pass) for the MXU fast path.
    x = x_ref[...].astype(jnp.bfloat16)
    # fc1: bf16 x bf16 MXU matmul, f32 accumulate, f32 bias + ReLU.
    h = jnp.dot(x, w1_ref[...], preferred_element_type=jnp.float32) + b1_ref[...]
    h = jnp.maximum(h, 0.0)
    # fc2 (re-cast activation to bf16 so the MXU stays on the bf16 path).
    h = jnp.dot(h.astype(jnp.bfloat16), w2_ref[...],
                preferred_element_type=jnp.float32) + b2_ref[...]
    h = jnp.maximum(h, 0.0)
    # fc3 (lane-padded output: padded columns hit zero weights/bias -> exact zeros).
    y = jnp.dot(h.astype(jnp.bfloat16), w3_ref[...],
                preferred_element_type=jnp.float32) + b3_ref[...]
    o_ref[...] = y.astype(o_ref.dtype)


# --------------------------------------------------------------------------------------
# One-time parameter preparation (hoisted out of the per-call hot path)
# --------------------------------------------------------------------------------------
def prepare_params(params):
    """Cast weights to bf16 and lane-pad fc3 once; call at init time, not per forward."""
    w3, b3 = params["w3"], params["b3"]
    cout = w3.shape[1]
    cpad = max(LANE, ((cout + LANE - 1) // LANE) * LANE)
    w3p = jnp.zeros((w3.shape[0], cpad), jnp.bfloat16).at[:, :cout].set(w3.astype(jnp.bfloat16))
    b3p = jnp.zeros((1, cpad), jnp.float32).at[:, :cout].set(b3.astype(jnp.float32))
    return {
        "w1": params["w1"].astype(jnp.bfloat16), "b1": params["b1"].astype(jnp.float32),
        "w2": params["w2"].astype(jnp.bfloat16), "b2": params["b2"].astype(jnp.float32),
        "w3p": w3p, "b3p": b3p,
        "out_channels": cout,
    }


# --------------------------------------------------------------------------------------
# Tiling helpers
# --------------------------------------------------------------------------------------
def _num_tensorcores():
    """Best-effort TC-per-chip count (v7x has 2); falls back to 1."""
    try:
        kind = jax.devices()[0].device_kind.lower()
    except Exception:
        return 1
    return 2 if "v7" in kind else 1


def _pick_block_b(B, block_b, num_cores):
    """Pick the batch tile: as large as possible (VMEM is not the constraint), but on
    multi-TC chips cap it so the grid has >= num_cores parallel steps."""
    if block_b is None:
        block_b = 1024  # amortizes ~0.35us/grid-step overhead; a few MiB of VMEM at most.
    if num_cores > 1:
        block_b = min(block_b, pl.cdiv(B, num_cores))
    block_b = min(block_b, B)
    if block_b < B:
        # Tiled along batch: second-to-last block dim must be a multiple of 8 (sublane).
        block_b = max(8, (block_b // 8) * 8)
    return block_b


# --------------------------------------------------------------------------------------
# Forward wrapper
# --------------------------------------------------------------------------------------
def class_head_forward(x, prepared, *, block_b=None, num_cores=None,
                       out_dtype=jnp.bfloat16):
    """x: (B, in_channels) float32. prepared: output of prepare_params().

    Returns the *lane-padded* (B, Cpad) output; slice [:, :prepared['out_channels']]
    at the consumer (so the slice can fuse into whatever reads it)."""
    B, cin = x.shape
    w1, b1 = prepared["w1"], prepared["b1"]     # (Cin, Cin//2), (1, Cin//2)
    w2, b2 = prepared["w2"], prepared["b2"]     # (Cin//2, Cin//4), (1, Cin//4)
    w3p, b3p = prepared["w3p"], prepared["b3p"] # (Cin//4, Cpad), (1, Cpad)
    h1, h2, cpad = w1.shape[1], w2.shape[1], w3p.shape[1]

    if num_cores is None:
        num_cores = _num_tensorcores()
    bb = _pick_block_b(B, block_b, num_cores)
    grid = (pl.cdiv(B, bb),)

    # Constant-index weight/bias specs: DMA'd once, VMEM-resident across the whole grid
    # (weights are ~0.3 MiB total, so default double-buffering is a non-issue).
    full = lambda a: pl.BlockSpec(a.shape, lambda i: (0, 0))

    flops = 2 * B * (cin * h1 + h1 * h2 + h2 * cpad)
    bytes_accessed = int(
        B * cin * x.dtype.itemsize                      # x read (f32)
        + (w1.size + w2.size + w3p.size) * 2            # bf16 weights
        + (b1.size + b2.size + b3p.size) * 4            # f32 biases
        + B * cpad * jnp.dtype(out_dtype).itemsize      # padded output write
    )

    out_padded = pl.pallas_call(
        class_head_kernel,
        out_shape=jax.ShapeDtypeStruct((B, cpad), out_dtype),
        grid_spec=pl.GridSpec(
            grid=grid,
            in_specs=[
                pl.BlockSpec((bb, cin), lambda i: (i, 0)),
                full(w1), full(b1), full(w2), full(b2), full(w3p), full(b3p),
            ],
            out_specs=pl.BlockSpec((bb, cpad), lambda i: (i, 0)),
        ),
        compiler_params=pltpu.CompilerParams(dimension_semantics=("parallel",)),
        cost_estimate=pl.CostEstimate(flops=flops, transcendentals=0,
                                      bytes_accessed=bytes_accessed),
    )(x, w1, b1, w2, b2, w3p, b3p)

    return out_padded


# --------------------------------------------------------------------------------------
# Init + pure-JAX reference
# --------------------------------------------------------------------------------------
def init_params(key, in_channels=512, out_channels=2):
    """Deterministic synthetic init (shapes match the nn.Linear layers of ClassHead)."""
    h1, h2 = in_channels // 2, in_channels // 4
    ks = jax.random.split(key, 6)

    def lin(kw, kb, fan_in, fan_out):
        # PyTorch-style uniform(-1/sqrt(fan_in), 1/sqrt(fan_in)); stored as (in, out).
        bound = 1.0 / jnp.sqrt(fan_in)
        w = jax.random.uniform(kw, (fan_in, fan_out), jnp.float32, -bound, bound)
        b = jax.random.uniform(kb, (1, fan_out), jnp.float32, -bound, bound)
        return w, b

    w1, b1 = lin(ks[0], ks[1], in_channels, h1)
    w2, b2 = lin(ks[2], ks[3], h1, h2)
    w3, b3 = lin(ks[4], ks[5], h2, out_channels)
    return {"w1": w1, "b1": b1, "w2": w2, "b2": b2, "w3": w3, "b3": b3}


def reference_forward(x, p):
    """Pure-JAX reference using the same bf16-input / f32-accumulate recipe."""
    bf = jnp.bfloat16
    h = jnp.dot(x.astype(bf), p["w1"].astype(bf), preferred_element_type=jnp.float32) + p["b1"]
    h = jnp.maximum(h, 0.0)
    h = jnp.dot(h.astype(bf), p["w2"].astype(bf), preferred_element_type=jnp.float32) + p["b2"]
    h = jnp.maximum(h, 0.0)
    return jnp.dot(h.astype(bf), p["w3"].astype(bf), preferred_element_type=jnp.float32) + p["b3"]


# --------------------------------------------------------------------------------------
# Self-test
# --------------------------------------------------------------------------------------
if __name__ == "__main__":
    key = jax.random.PRNGKey(0)
    k_x, k_p = jax.random.split(key)

    B, C_IN, C_OUT = 64, 128, 2   # small shapes; in_channels divisible by 4 as the module requires
    x = jax.random.normal(k_x, (B, C_IN), jnp.float32)
    raw_params = init_params(k_p, C_IN, C_OUT)
    prepared = prepare_params(raw_params)   # one-time prep, outside the hot path

    # Main run (auto tile: single grid step on v5e/v6e, >=2 steps on v7x).
    out_padded = class_head_forward(x, prepared)
    out_padded = jax.block_until_ready(out_padded)

    out = out_padded[:, :C_OUT].astype(jnp.float32)   # slice at the consumer
    ref = reference_forward(x, raw_params)
    assert out.shape == (B, C_OUT)
    # bf16 matmul inputs + bf16 output store -> relaxed tolerance vs identically-cast ref.
    assert jnp.allclose(out, ref, atol=2e-2, rtol=2e-2)
    # Padded columns hit zero weights & zero bias -> must be exactly zero.
    assert jnp.all(out_padded[:, C_OUT:] == 0)

    # Edge-block check: batch not a multiple of the tile (partial trailing block).
    B2 = 40
    x2 = jax.random.normal(jax.random.PRNGKey(1), (B2, C_IN), jnp.float32)
    out2 = class_head_forward(x2, prepared, block_b=16, num_cores=1)
    out2 = jax.block_until_ready(out2)
    ref2 = reference_forward(x2, raw_params)
    assert jnp.allclose(out2[:, :C_OUT].astype(jnp.float32), ref2, atol=2e-2, rtol=2e-2)

    print("KERNEL_OK")
</pallas_src>

<mosaic_0001>
module attributes {stable_mosaic.version = 11 : i64} {
  func.func @class_head_kernel(%arg0: i32, %arg1: memref<64x128xf32, #tpu.memory_space<vmem>>, %arg2: memref<128x64xbf16, #tpu.memory_space<vmem>>, %arg3: memref<1x64xf32, #tpu.memory_space<vmem>>, %arg4: memref<64x32xbf16, #tpu.memory_space<vmem>>, %arg5: memref<1x32xf32, #tpu.memory_space<vmem>>, %arg6: memref<32x128xbf16, #tpu.memory_space<vmem>>, %arg7: memref<1x128xf32, #tpu.memory_space<vmem>>, %arg8: memref<64x128xbf16, #tpu.memory_space<vmem>>) attributes {dimension_semantics = [#tpu.dimension_semantics<parallel>], iteration_bounds = array<i64: 1>, scalar_prefetch = 0 : i64, scratch_operands = 0 : i64, tpu.core_type = #tpu.core_type<tc>, window_params = [{transform_indices = @transform_0, window_bounds = array<i64: 64, 128>}, {pipeline_mode = #tpu.pipeline_mode<synchronous>, transform_indices = @transform_1, window_bounds = array<i64: 128, 64>}, {pipeline_mode = #tpu.pipeline_mode<synchronous>, transform_indices = @transform_2, window_bounds = array<i64: 1, 64>}, {pipeline_mode = #tpu.pipeline_mode<synchronous>, transform_indices = @transform_3, window_bounds = array<i64: 64, 32>}, {pipeline_mode = #tpu.pipeline_mode<synchronous>, transform_indices = @transform_4, window_bounds = array<i64: 1, 32>}, {pipeline_mode = #tpu.pipeline_mode<synchronous>, transform_indices = @transform_5, window_bounds = array<i64: 32, 128>}, {pipeline_mode = #tpu.pipeline_mode<synchronous>, transform_indices = @transform_6, window_bounds = array<i64: 1, 128>}, {transform_indices = @transform_7, window_bounds = array<i64: 64, 128>}]} {
    %c0 = arith.constant 0 : index
    %c0_0 = arith.constant 0 : index
    %0 = vector.load %arg1[%c0, %c0_0] : memref<64x128xf32, #tpu.memory_space<vmem>>, vector<64x128xf32>
    %1 = arith.truncf %0 : vector<64x128xf32> to vector<64x128xbf16>
    %c0_1 = arith.constant 0 : index
    %c0_2 = arith.constant 0 : index
    %2 = vector.load %arg2[%c0_1, %c0_2] : memref<128x64xbf16, #tpu.memory_space<vmem>>, vector<128x64xbf16>
    %cst = arith.constant dense<0.000000e+00> : vector<64x64xf32>
    %3 = tpu.matmul %1, %2, %cst {dimension_numbers = #tpu.dot_dimension_numbers<[1], [0], [0], [1], [0, 0, 1, 1], [], []>} : vector<64x128xbf16>, vector<128x64xbf16>, vector<64x64xf32> -> vector<64x64xf32>
    %c0_3 = arith.constant 0 : index
    %c0_4 = arith.constant 0 : index
    %4 = vector.load %arg3[%c0_3, %c0_4] : memref<1x64xf32, #tpu.memory_space<vmem>>, vector<1x64xf32>
    %5 = vector.broadcast %4 : vector<1x64xf32> to vector<64x64xf32>
    %6 = arith.addf %3, %5 : vector<64x64xf32>
    %cst_5 = arith.constant 0.000000e+00 : f32
    %7 = vector.broadcast %cst_5 : f32 to vector<64x64xf32>
    %8 = arith.maximumf %6, %7 : vector<64x64xf32>
    %9 = arith.truncf %8 : vector<64x64xf32> to vector<64x64xbf16>
    %c0_6 = arith.constant 0 : index
    %c0_7 = arith.constant 0 : index
    %10 = vector.load %arg4[%c0_6, %c0_7] : memref<64x32xbf16, #tpu.memory_space<vmem>>, vector<64x32xbf16>
    %cst_8 = arith.constant dense<0.000000e+00> : vector<64x32xf32>
    %11 = tpu.matmul %9, %10, %cst_8 {dimension_numbers = #tpu.dot_dimension_numbers<[1], [0], [0], [1], [0, 0, 1, 1], [], []>} : vector<64x64xbf16>, vector<64x32xbf16>, vector<64x32xf32> -> vector<64x32xf32>
    %c0_9 = arith.constant 0 : index
    %c0_10 = arith.constant 0 : index
    %12 = vector.load %arg5[%c0_9, %c0_10] : memref<1x32xf32, #tpu.memory_space<vmem>>, vector<1x32xf32>
    %13 = vector.broadcast %12 : vector<1x32xf32> to vector<64x32xf32>
    %14 = arith.addf %11, %13 : vector<64x32xf32>
    %cst_11 = arith.constant 0.000000e+00 : f32
    %15 = vector.broadcast %cst_11 : f32 to vector<64x32xf32>
    %16 = arith.maximumf %14, %15 : vector<64x32xf32>
    %17 = arith.truncf %16 : vector<64x32xf32> to vector<64x32xbf16>
    %c0_12 = arith.constant 0 : index
    %c0_13 = arith.constant 0 : index
    %18 = vector.load %arg6[%c0_12, %c0_13] : memref<32x128xbf16, #tpu.memory_space<vmem>>, vector<32x128xbf16>
    %cst_14 = arith.constant dense<0.000000e+00> : vector<64x128xf32>
    %19 = tpu.matmul %17, %18, %cst_14 {dimension_numbers = #tpu.dot_dimension_numbers<[1], [0], [0], [1], [0, 0, 1, 1], [], []>} : vector<64x32xbf16>, vector<32x128xbf16>, vector<64x128xf32> -> vector<64x128xf32>
    %c0_15 = arith.constant 0 : index
    %c0_16 = arith.constant 0 : index
    %20 = vector.load %arg7[%c0_15, %c0_16] : memref<1x128xf32, #tpu.memory_space<vmem>>, vector<1x128xf32>
    %21 = vector.broadcast %20 : vector<1x128xf32> to vector<64x128xf32>
    %22 = arith.addf %19, %21 : vector<64x128xf32>
    %23 = arith.truncf %22 : vector<64x128xf32> to vector<64x128xbf16>
    %c0_17 = arith.constant 0 : index
    %c0_18 = arith.constant 0 : index
    %24 = vector.load %arg8[%c0_17, %c0_18] : memref<64x128xbf16, #tpu.memory_space<vmem>>, vector<64x128xbf16>
    tpu.vector_store %arg8[%c0_17, %c0_18], %23 {strides = array<i32>} : memref<64x128xbf16, #tpu.memory_space<vmem>>, vector<64x128xbf16>,
    return
  }
  func.func @transform_0(%arg0: i32) -> (i32, i32) {
    %c0_i32 = arith.constant 0 : i32
    %c0_i32_0 = arith.constant 0 : i32
    return %arg0, %c0_i32 : i32, i32
  }
  func.func @transform_1(%arg0: i32) -> (i32, i32) {
    %c0_i32 = arith.constant 0 : i32
    %c0_i32_0 = arith.constant 0 : i32
    %c0_i32_1 = arith.constant 0 : i32
    return %c0_i32, %c0_i32_0 : i32, i32
  }
  func.func @transform_2(%arg0: i32) -> (i32, i32) {
    %c0_i32 = arith.constant 0 : i32
    %c0_i32_0 = arith.constant 0 : i32
    %c0_i32_1 = arith.constant 0 : i32
    return %c0_i32, %c0_i32_0 : i32, i32
  }
  func.func @transform_3(%arg0: i32) -> (i32, i32) {
    %c0_i32 = arith.constant 0 : i32
    %c0_i32_0 = arith.constant 0 : i32
    %c0_i32_1 = arith.constant 0 : i32
    return %c0_i32, %c0_i32_0 : i32, i32
  }
  func.func @transform_4(%arg0: i32) -> (i32, i32) {
    %c0_i32 = arith.constant 0 : i32
    %c0_i32_0 = arith.constant 0 : i32
    %c0_i32_1 = arith.constant 0 : i32
    return %c0_i32, %c0_i32_0 : i32, i32
  }
  func.func @transform_5(%arg0: i32) -> (i32, i32) {
    %c0_i32 = arith.constant 0 : i32
    %c0_i32_0 = arith.constant 0 : i32
    %c0_i32_1 = arith.constant 0 : i32
    return %c0_i32, %c0_i32_0 : i32, i32
  }
  func.func @transform_6(%arg0: i32) -> (i32, i32) {
    %c0_i32 = arith.constant 0 : i32
    %c0_i32_0 = arith.constant 0 : i32
    %c0_i32_1 = arith.constant 0 : i32
    return %c0_i32, %c0_i32_0 : i32, i32
  }
  func.func @transform_7(%arg0: i32) -> (i32, i32) {
    %c0_i32 = arith.constant 0 : i32
    %c0_i32_0 = arith.constant 0 : i32
    return %arg0, %c0_i32 : i32, i32
  }
}

</mosaic_0001>

<bundles_post_ra>
// kernel: tpu_custom_call.1
= control target key start
LH: loop header
LB: loop body
LE: loop exit
PB: predicated region body
PF: predicated region fallthrough
CT: control target
= control target key end

     0   :  { %s795_s0 = inlined_call_operand.vmem [shape: f32[64,128], index: 0, kind: input, shape index: {}]   ;;  %s796_s1 = inlined_call_operand.vmem [shape: bf16[128,64], index: 1, kind: input, shape index: {}]   ;;  %s797_s2 = inlined_call_operand.vmem [shape: f32[1,64], index: 2, kind: input, shape index: {}]   ;;  %s798_s3 = inlined_call_operand.vmem [shape: bf16[64,32], index: 3, kind: input, shape index: {}]   ;;  %s799_s4 = inlined_call_operand.vmem [shape: f32[1,32], index: 4, kind: input, shape index: {}]   ;;  %s800_s5 = inlined_call_operand.vmem [shape: bf16[32,128], index: 5, kind: input, shape index: {}]   ;;  %s801_s6 = inlined_call_operand.vmem [shape: f32[1,128], index: 6, kind: input, shape index: {}]   ;;  %s802_s7 = inlined_call_operand.hbm [shape: bf16[64,128], index: 7, kind: output, shape index: {}]  }
   0x1   :  { %v619_v0 = vld [vmem:[%s796_s1] sm:$0xff]   ;;  %v620_v1 = vld [vmem:[%s796_s1 + $0x8] sm:$0xff]   ;;  %v621_v2 = vld [vmem:[%s796_s1 + $0x10] sm:$0xff]  }
   0x2   :  { %564 = vmatprep.subr.bf16.mxu0 %v619_v0  ;;  %v622_v3 = vld [vmem:[%s796_s1 + $0x18] sm:$0xff]   ;;  %v28_v4 = vld [vmem:[%s795_s0] sm:$0xff]  ;;  %v29_v5 = vld [vmem:[%s795_s0 + $0x8] sm:$0xff] }
   0x3   :  { %565 = vmatpush3.bf16.msra.mxu0 %v619_v0  ;;  %v36_v6 = vpack.c.bf16 %v29_v5, %v28_v4  ;;  %v623_v7 = vld [vmem:[%s796_s1 + $0x20] sm:$0xff]   ;;  %v628_v9 = vld [vmem:[%s798_s3 + $0x8] sm:$0xff]  }
   0x4   :  { %566 = vmatprep.subr.bf16.mxu0 %v620_v1  ;;  %v627_v8 = vld [vmem:[%s798_s3] sm:$0xff]  }
   0x5   :  { %580 = vmatprep.mubr.bf16.mxu0 %v36_v6  ;;  %588 = vmatprep.subr.bf16.mxu1 %v627_v8 }
   0x6   :  { %589 = vmatpush3.bf16.msra.mxu1 %v627_v8 }
   0x7   :  { %567 = vmatpush3.bf16.msra.mxu0 %v620_v1  ;;  %590 = vmatprep.subr.bf16.mxu1 %v628_v9 }
   0x8   :  { %568 = vmatprep.subr.bf16.mxu0 %v621_v2 }
   0xb   :  { %569 = vmatpush3.bf16.msra.mxu0 %v621_v2 }
   0xc   :  { %570 = vmatprep.subr.bf16.mxu0 %v622_v3 }
   0xf   :  { %571 = vmatpush3.bf16.msra.mxu0 %v622_v3 }
  0x10   :  { %12 = vsyncpa [#allocation3], 0  ;;  %572 = vmatprep.subr.bf16.mxu0 %v623_v7  ;;  %v624_v10 = vld [vmem:[%s796_s1 + $0x28] sm:$0xff]   ;;  %591 = vmatpush3.bf16.msra.mxu1 %v628_v9  ;;  %v625_v11 = vld [vmem:[%s796_s1 + $0x30] sm:$0xff]   ;;  %vm227_vm0 = vcmask 523264   ;;  %vm340_vm1 = vcmask 261120  }
  0x11   :  { %v626_v12 = vld [vmem:[%s796_s1 + $0x38] sm:$0xff]   ;;  %v30_v13 = vld [vmem:[%s795_s0 + $0x10] sm:$0xff]  ;;  %v32_v15 = vld [vmem:[%s795_s0 + $0x20] sm:$0xff]  ;;  %s657_s22 = smov [#allocation2]  }
  0x12   :  { %v31_v14 = vld [vmem:[%s795_s0 + $0x18] sm:$0xff]  ;;  %v33_v16 = vld [vmem:[%s795_s0 + $0x28] sm:$0xff]  ;;  %v34_v19 = vld [vmem:[%s795_s0 + $0x30] sm:$0xff]  ;;  %s463_s23 = sshll.u32 %s657_s22, 4  ;;  %s464_s23 = int_to_ptr.vmem [resolvable:$true] %s463_s23 }
  0x13   :  { %573 = vmatpush3.bf16.msra.mxu0 %v623_v7  ;;  %v37_v17 = vpack.c.bf16 %v31_v14, %v30_v13  ;;  %v38_v18 = vpack.c.bf16 %v33_v16, %v32_v15  ;;  %v35_v20 = vld [vmem:[%s795_s0 + $0x38] sm:$0xff]  ;;  %v629_v22 = vld [vmem:[%s798_s3 + $0x10] sm:$0xff]   ;;  %v631_v24 = vld [vmem:[%s800_s5] sm:$0xff]   ;;  %p638_p1 = scmp.lt.s32.totalorder %s464_s23, %s464_s23 }
  0x14   :  { %574 = vmatprep.subr.bf16.mxu0 %v624_v10  ;;  %v39_v21 = vpack.c.bf16 %v35_v20, %v34_v19  ;;  %592 = vmatprep.subr.bf16.mxu1 %v629_v22  ;;  %v630_v23 = vld [vmem:[%s798_s3 + $0x18] sm:$0xff]   ;;  %v474_v25 = vld [vmem:[%s797_s2] ss:$0 sm:$0xff]  ;;  %v632_v54 = vld [vmem:[%s800_s5 + $0x8] sm:$0xff]  }
  0x15   :  { %593 = vmatpush3.bf16.msra.mxu1 %v629_v22  ;;  %v483_v55 = vld [vmem:[%s799_s4] ss:$0 sm:$0xff] }
  0x16   :  { %594 = vmatprep.subr.bf16.mxu1 %v630_v23 }
  0x17   :  { %575 = vmatpush3.bf16.msra.mxu0 %v624_v10 }
  0x18   :  { %576 = vmatprep.subr.bf16.mxu0 %v625_v11 }
  0x19   :  { %595 = vmatpush3.bf16.msra.mxu1 %v630_v23 }
  0x1a   :  { %604 = vmatprep.subr.bf16.mxu1 %v631_v24 }
  0x1b   :  { %577 = vmatpush3.bf16.msra.mxu0 %v625_v11 }
  0x1c   :  { %578 = vmatprep.subr.bf16.mxu0 %v626_v12 }
  0x1f   :  { %579 = vmatpush3.bf16.msra.mxu0 %v626_v12 }
  0x22   :  { %581 = vmatmul.mubr.bf16.vlgmr.msra.gmra.mrb[0].mxu0 %v37_v17 }
  0x23   :  { %584 = vmatprep.mubr.bf16.mxu0 %v38_v18 }
  0x2a   :  { %585 = vmatmul.mubr.bf16.gmra.mrb[4].mxu0 %v39_v21  ;;  %v492_v21 = vld [vmem:[%s801_s6] ss:$0 sm:$0xff]  ;;  %s633_s6 = scalar_lea.vmem %s464_s23, 512 }
  0x2b   :  { %p634_p0 = scmp.ne.s32.totalorder %s464_s23, %s633_s6  ;;  %p639_p2 = scmp.lt.s32.totalorder %s633_s6, %s633_s6 }
  0x2d   :  { %p640_p3 = por %p639_p2, %p638_p1 }
  0x2f   :  { %p641_p4 = pnand %p640_p3, %p634_p0 }
  0xf5   :  { %v582_v26 = vpop.f32.mrb[0].mxu0 }
  0xf6   :  { %v154_v27 = vadd.f32 %v582_v26, %v474_v25  ;;  %v145_v28 = vpop.f32.mrb[1].mxu0 }
  0xf7   :  { %v146_v29 = vadd.f32 %v474_v25, %v145_v28  ;;  %v583_v30 = vpop.f32.mrb[2].mxu0 }
  0xf8   :  { %v157_v31 = vadd.f32 %v583_v30, %v474_v25  ;;  %v148_v32 = vpop.f32.mrb[3].mxu0  ;;  %v178_v34 = vmax.f32 %v154_v27, 0.0 }
  0xf9   :  { %v149_v33 = vadd.f32 %v474_v25, %v148_v32  ;;  %v176_v36 = vmax.f32 %v146_v29, 0.0 }
  0xfa   :  { %v179_v35 = vmax.f32 %v157_v31, 0.0 }
  0xfb   :  { %v177_v37 = vmax.f32 %v149_v33, 0.0 }
  0xfc   :  { %v185_v38 = vpack.c.bf16 %v179_v35, %v178_v34 }
  0xfd   :  { %v586_v39 = vpop.f32.mrb[4].mxu0  ;;  %v184_v40 = vpack.c.bf16 %v177_v37, %v176_v36 }
  0xfe   :  { %v170_v41 = vadd.f32 %v586_v39, %v474_v25  ;;  %v161_v42 = vpop.f32.mrb[5].mxu0 }
  0xff   :  { %v162_v43 = vadd.f32 %v474_v25, %v161_v42  ;;  %v587_v44 = vpop.f32.mrb[6].mxu0  ;;  %596 = vmatprep.mubr.msk.bf16.mxu1 %vm227_vm0, %v184_v40 }
 0x100   :  { %v173_v45 = vadd.f32 %v587_v44, %v474_v25  ;;  %v164_v46 = vpop.f32.mrb[7].mxu0  ;;  %597 = vmatmul.mubr.msk.bf16.vlgmr.msra.gmra.mrb[0].mxu1 %vm227_vm0, %v185_v38  ;;  %v182_v48 = vmax.f32 %v170_v41, 0.0 }
 0x101   :  { %v165_v47 = vadd.f32 %v474_v25, %v164_v46  ;;  %605 = vmatpush3.bf16.msra.mxu1 %v631_v24  ;;  %v180_v50 = vmax.f32 %v162_v43, 0.0 }
 0x102   :  { %v183_v49 = vmax.f32 %v173_v45, 0.0  ;;  %606 = vmatprep.subr.bf16.mxu1 %v632_v54 }
 0x103   :  { %v181_v51 = vmax.f32 %v165_v47, 0.0 }
 0x104   :  { %v187_v52 = vpack.c.bf16 %v183_v49, %v182_v48 }
 0x105   :  { %v186_v53 = vpack.c.bf16 %v181_v51, %v180_v50  ;;  %607 = vmatpush3.bf16.msra.mxu1 %v632_v54 }
 0x107   :  { %600 = vmatprep.mubr.msk.bf16.mxu1 %vm227_vm0, %v186_v53 }
 0x108   :  { %601 = vmatmul.mubr.msk.bf16.gmra.mrb[4].mxu1 %vm227_vm0, %v187_v52 }
 0x1d3   :  { %v598_v56 = vpop.f32.mrb[0].mxu1 }
 0x1d4   :  { %v283_v57 = vadd.f32 %v598_v56, %v483_v55  ;;  %v274_v58 = vpop.f32.mrb[1].mxu1 }
 0x1d5   :  { %v275_v59 = vadd.f32 %v483_v55, %v274_v58  ;;  %v599_v60 = vpop.f32.mrb[2].mxu1 }
 0x1d6   :  { %v286_v61 = vadd.f32 %v599_v60, %v483_v55  ;;  %v277_v62 = vpop.f32.mrb[3].mxu1  ;;  %v307_v0 = vmax.f32 %v283_v57, 0.0 }
 0x1d7   :  { %v278_v63 = vadd.f32 %v483_v55, %v277_v62  ;;  %v305_v2 = vmax.f32 %v275_v59, 0.0 }
 0x1d8   :  { %v308_v1 = vmax.f32 %v286_v61, 0.0 }
 0x1d9   :  { %v306_v3 = vmax.f32 %v278_v63, 0.0 }
 0x1da   :  { %v314_v4 = vpack.c.bf16 %v308_v1, %v307_v0 }
 0x1db   :  { %v313_v5 = vpack.c.bf16 %v306_v3, %v305_v2  ;;  %v602_v6 = vpop.f32.mrb[4].mxu1 }
 0x1dc   :  { %v299_v7 = vadd.f32 %v602_v6, %v483_v55  ;;  %v290_v8 = vpop.f32.mrb[5].mxu1 }
 0x1dd   :  { %v291_v9 = vadd.f32 %v483_v55, %v290_v8  ;;  %v603_v10 = vpop.f32.mrb[6].mxu1  ;;  %608 = vmatprep.mubr.msk.bf16.mxu1 %vm340_vm1, %v313_v5 }
 0x1de   :  { %v302_v11 = vadd.f32 %v603_v10, %v483_v55  ;;  %v293_v12 = vpop.f32.mrb[7].mxu1  ;;  %609 = vmatmul.mubr.msk.bf16.vlgmr.msra.gmra.mrb[8].mxu1 %vm340_vm1, %v314_v4  ;;  %v311_v14 = vmax.f32 %v299_v7, 0.0 }
 0x1df   :  { %v294_v13 = vadd.f32 %v483_v55, %v293_v12  ;;  %v309_v16 = vmax.f32 %v291_v9, 0.0 }
 0x1e0   :  { %v312_v15 = vmax.f32 %v302_v11, 0.0 }
 0x1e1   :  { %v310_v17 = vmax.f32 %v294_v13, 0.0 }
 0x1e2   :  { %v316_v18 = vpack.c.bf16 %v312_v15, %v311_v14 }
 0x1e3   :  { %v315_v19 = vpack.c.bf16 %v310_v17, %v309_v16 }
 0x1e5   :  { %612 = vmatprep.mubr.msk.bf16.mxu1 %vm340_vm1, %v315_v19 }
 0x1e6   :  { %613 = vmatmul.mubr.msk.bf16.gmra.mrb[12].mxu1 %vm340_vm1, %v316_v18 }
 0x2b1   :  { %v610_v20 = vpop.f32.mrb[8].mxu1 }
 0x2b2   :  { %v387_v22 = vpop.f32.mrb[9].mxu1  ;;  %v396_v24 = vadd.f32 %v610_v20, %v492_v21 }
 0x2b3   :  { %v611_v23 = vpop.f32.mrb[10].mxu1  ;;  %v388_v27 = vadd.f32 %v492_v21, %v387_v22 }
 0x2b4   :  { %v399_v25 = vadd.f32 %v611_v23, %v492_v21  ;;  %v390_v26 = vpop.f32.mrb[11].mxu1 }
 0x2b5   :  { %v391_v28 = vadd.f32 %v492_v21, %v390_v26 }
 0x2b6   :  { %v523_v29 = vpack.c.bf16 %v399_v25, %v396_v24 }
 0x2b7   :  { %v518_v30 = vpack.c.bf16 %v391_v28, %v388_v27 }
 0x2b8   :  { %535 = vst [vmem:[#allocation2 + $0x8] sm:$0xff] %v523_v29  }
 0x2b9   :  { %519 = vst [vmem:[#allocation2] sm:$0xff] %v518_v30   ;;  %v614_v31 = vpop.f32.mrb[12].mxu1 }
 0x2ba   :  { %v403_v32 = vpop.f32.mrb[13].mxu1  ;;  %v412_v34 = vadd.f32 %v614_v31, %v492_v21 }
 0x2bb   :  { %v615_v33 = vpop.f32.mrb[14].mxu1  ;;  %v404_v37 = vadd.f32 %v492_v21, %v403_v32 }
 0x2bc   :  { %v415_v35 = vadd.f32 %v615_v33, %v492_v21  ;;  %v406_v36 = vpop.f32.mrb[15].mxu1 }
 0x2bd   :  { %v407_v38 = vadd.f32 %v492_v21, %v406_v36 }
 0x2be   :  { %v533_v39 = vpack.c.bf16 %v415_v35, %v412_v34 }
 0x2bf   :  { %v528_v40 = vpack.c.bf16 %v407_v38, %v404_v37 }
 0x2c0   :  { %537 = vst [vmem:[#allocation2 + $0x18] sm:$0xff] %v533_v39  }
 0x2c1   :  { %536 = vst [vmem:[#allocation2 + $0x10] sm:$0xff] %v528_v40  }
 0x2c2   :  { %644 = shalt.err (!%p641_p4)
}
 0x2c3   :  { %s645_s26 = scalar_lea.hbm %s802_s7, 512 }
 0x2c4   :  { %p646_p5 = scmp.ne.s32.totalorder %s802_s7, %s645_s26  ;;  %p649_p6 = scmp.lt.u32.totalorder %s645_s26, %s802_s7 }
 0x2c6   :  { %p651_p7 = pnand %p649_p6, %p646_p5 }
 0x2c8   :  { %654 = shalt.err (!%p651_p7)
}
 0x2c9   :  { %s658_s8 = smov 64   ;;  %s659_s9 = smov 4  }
 0x2ca   :  { %469 = dma.vmem_to_hbm [thread:$0]  %s464_s23, 512, %s802_s7, [#allocation3], %s658_s8, %s658_s8, %s659_s9  }
 0x2cb   :  { %655 = dma.done.wait [#allocation3], 512  }
 0x2cc   :  { %656 = vsyncadd [#allocation3], 4294966784 }
 0x2cd   :  { %473 = vsyncpa [#allocation3], 1 }

</bundles_post_ra>
